<compile_context>
chip_gen: v5e
topology: v5e:2x2
jax: 0.10.0
libtpu: 0.0.40
codegen_flags: <defaults>
</compile_context>

<pallas_src>
import math
from functools import partial

import jax
import jax.numpy as jnp
from jax.experimental import pallas as pl
from jax.experimental.pallas import tpu as pltpu


# ----------------------------------------------------------------------------
# Pallas kernel: fused (patch-matrix @ weight) + bias + LayerNorm over E
# ----------------------------------------------------------------------------
def _patch_embed_kernel(p_ref, w_ref, b_ref, g_ref, beta_ref, o_ref, *, eps):
    # p_ref: (TM, K) bf16   patch-matrix tile
    # w_ref: (K,  E) bf16   conv weight (resident across grid)
    # b_ref/g_ref/beta_ref: (1, E) f32
    # o_ref: (TM, E) f32
    acc = jnp.dot(p_ref[...], w_ref[...], preferred_element_type=jnp.float32)
    acc = acc + b_ref[...]                                    # conv bias (f32)

    # LayerNorm over last dim (embed_dim), torch eps placement: rsqrt(var+eps)
    mean = jnp.mean(acc, axis=-1, keepdims=True)
    centered = acc - mean
    var = jnp.mean(centered * centered, axis=-1, keepdims=True)
    inv = jax.lax.rsqrt(var + eps)
    o_ref[...] = (centered * inv * g_ref[...] + beta_ref[...]).astype(o_ref.dtype)


def _round_up(x, m):
    return (x + m - 1) // m * m


def overlap_patch_embed(x, w_conv, b_conv, ln_gamma, ln_beta,
                        *, patch_size=7, stride=4, eps=1e-5, tile_m=1024):
    """x: (B, C, H, W) float32.  Returns (tokens (B, Ho*Wo, E), Ho, Wo)."""
    B, C, H, W = x.shape
    E = w_conv.shape[0]
    kh = kw = patch_size
    ph = pw = patch_size // 2

    Ho = (H + 2 * ph - kh) // stride + 1
    Wo = (W + 2 * pw - kw) // stride + 1
    M = B * Ho * Wo
    K = kh * kw * C

    # ---- glue: im2col built directly in final (M, K) layout ---------------
    # NHWC view so channels ride the fast axis; flatten order is (kh, kw, C).
    # TODO(synk): the strided patch gather stays in XLA; folding it into the
    # kernel would need manual DMA of overlapping rows (pl.ANY + async copy).
    x_nhwc = jnp.transpose(x, (0, 2, 3, 1))                       # (B,H,W,C)
    xp = jnp.pad(x_nhwc, ((0, 0), (ph, ph), (pw, pw), (0, 0)))
    cols = [xp[:, i:i + stride * Ho:stride, j:j + stride * Wo:stride, :]
            for i in range(kh) for j in range(kw)]                # each (B,Ho,Wo,C)
    pat = jnp.stack(cols, axis=3).reshape(M, K)                   # (M, kh*kw*C)

    # conv weight (E, C, kh, kw) -> (K, E) with matching (kh, kw, C) order
    w_mat = jnp.transpose(w_conv, (2, 3, 1, 0)).reshape(K, E)

    # bf16 for the MXU input streams (dominant HBM traffic); f32 epilogue math
    pat = pat.astype(jnp.bfloat16)
    w_mat = w_mat.astype(jnp.bfloat16)

    b2 = b_conv.reshape(1, E).astype(jnp.float32)
    g2 = ln_gamma.reshape(1, E).astype(jnp.float32)
    be2 = ln_beta.reshape(1, E).astype(jnp.float32)

    # ---- tile M; pad rows so every block is full (LN is per-row => exact) --
    tm = tile_m if M >= tile_m else _round_up(M, 8)
    M_pad = _round_up(M, tm)
    if M_pad != M:
        pat = jnp.pad(pat, ((0, M_pad - M), (0, 0)))
    grid = (M_pad // tm,)

    out = pl.pallas_call(
        partial(_patch_embed_kernel, eps=eps),
        out_shape=jax.ShapeDtypeStruct((M_pad, E), jnp.float32),
        grid_spec=pltpu.PrefetchScalarGridSpec(
            num_scalar_prefetch=0,
            grid=grid,
            in_specs=[
                pl.BlockSpec((tm, K), lambda i: (i, 0)),   # patch tiles (pipelined)
                pl.BlockSpec((K, E), lambda i: (0, 0)),    # weight, resident
                pl.BlockSpec((1, E), lambda i: (0, 0)),    # bias
                pl.BlockSpec((1, E), lambda i: (0, 0)),    # gamma
                pl.BlockSpec((1, E), lambda i: (0, 0)),    # beta
            ],
            out_specs=pl.BlockSpec((tm, E), lambda i: (i, 0)),
        ),
        compiler_params=pltpu.CompilerParams(
            dimension_semantics=("parallel",)),
    )(pat, w_mat, b2, g2, be2)

    tokens = out[:M].reshape(B, Ho * Wo, E).astype(x.dtype)
    return tokens, Ho, Wo


# ----------------------------------------------------------------------------
# Deterministic parameter construction (mirrors module __init__ shapes/init)
# ----------------------------------------------------------------------------
def init_params(key, in_chans, embed_dim, patch_size):
    kh = kw = patch_size
    fan_out = kh * kw * embed_dim
    std = math.sqrt(2.0 / fan_out)
    w_conv = std * jax.random.normal(key, (embed_dim, in_chans, kh, kw),
                                     dtype=jnp.float32)
    b_conv = jnp.zeros((embed_dim,), jnp.float32)
    ln_gamma = jnp.ones((embed_dim,), jnp.float32)
    ln_beta = jnp.zeros((embed_dim,), jnp.float32)
    return w_conv, b_conv, ln_gamma, ln_beta


# ----------------------------------------------------------------------------
# Pure-JAX reference (same bf16 input quantization, f32 math) for validation
# ----------------------------------------------------------------------------
def _reference(x, w_conv, b_conv, ln_gamma, ln_beta, *, patch_size, stride, eps=1e-5):
    xq = x.astype(jnp.bfloat16).astype(jnp.float32)
    wq = w_conv.astype(jnp.bfloat16).astype(jnp.float32)
    p = patch_size // 2
    y = jax.lax.conv_general_dilated(
        xq, wq, window_strides=(stride, stride),
        padding=((p, p), (p, p)),
        dimension_numbers=('NCHW', 'OIHW', 'NCHW'))
    y = y + b_conv.reshape(1, -1, 1, 1)
    B, E, Ho, Wo = y.shape
    t = jnp.transpose(y.reshape(B, E, Ho * Wo), (0, 2, 1))        # (B, N, E)
    mean = jnp.mean(t, axis=-1, keepdims=True)
    c = t - mean
    var = jnp.mean(c * c, axis=-1, keepdims=True)
    return c * jax.lax.rsqrt(var + eps) * ln_gamma + ln_beta, Ho, Wo


if __name__ == "__main__":
    # Small shapes: B=2, C=4, 16x16 image, patch_size=7, stride=4, embed_dim=32
    B, C, H, W = 2, 4, 16, 16
    patch_size, stride, embed_dim = 7, 4, 32

    key = jax.random.PRNGKey(0)
    kx, kw_ = jax.random.split(key)
    x = jax.random.normal(kx, (B, C, H, W), dtype=jnp.float32)
    w_conv, b_conv, ln_gamma, ln_beta = init_params(kw_, C, embed_dim, patch_size)

    tokens, Ho, Wo = overlap_patch_embed(
        x, w_conv, b_conv, ln_gamma, ln_beta,
        patch_size=patch_size, stride=stride)
    tokens = jax.block_until_ready(tokens)

    assert tokens.shape == (B, Ho * Wo, embed_dim)

    ref, rHo, rWo = _reference(x, w_conv, b_conv, ln_gamma, ln_beta,
                               patch_size=patch_size, stride=stride)
    assert (Ho, Wo) == (rHo, rWo)
    assert jnp.max(jnp.abs(tokens - ref)) < 2e-2, "mismatch vs reference"

    print("KERNEL_OK")
</pallas_src>

<mosaic_0001>
module attributes {stable_mosaic.version = 11 : i64} {
  func.func @_patch_embed_kernel(%arg0: i32, %arg1: memref<32x196xbf16, #tpu.memory_space<vmem>>, %arg2: memref<196x32xbf16, #tpu.memory_space<vmem>>, %arg3: memref<1x32xf32, #tpu.memory_space<vmem>>, %arg4: memref<1x32xf32, #tpu.memory_space<vmem>>, %arg5: memref<1x32xf32, #tpu.memory_space<vmem>>, %arg6: memref<32x32xf32, #tpu.memory_space<vmem>>) attributes {dimension_semantics = [#tpu.dimension_semantics<parallel>], iteration_bounds = array<i64: 1>, scalar_prefetch = 0 : i64, scratch_operands = 0 : i64, tpu.core_type = #tpu.core_type<tc>, window_params = [{transform_indices = @transform_0, window_bounds = array<i64: 32, 196>}, {pipeline_mode = #tpu.pipeline_mode<synchronous>, transform_indices = @transform_1, window_bounds = array<i64: 196, 32>}, {pipeline_mode = #tpu.pipeline_mode<synchronous>, transform_indices = @transform_2, window_bounds = array<i64: 1, 32>}, {pipeline_mode = #tpu.pipeline_mode<synchronous>, transform_indices = @transform_3, window_bounds = array<i64: 1, 32>}, {pipeline_mode = #tpu.pipeline_mode<synchronous>, transform_indices = @transform_4, window_bounds = array<i64: 1, 32>}, {transform_indices = @transform_5, window_bounds = array<i64: 32, 32>}]} {
    %c0 = arith.constant 0 : index
    %c0_0 = arith.constant 0 : index
    %0 = vector.load %arg1[%c0, %c0_0] : memref<32x196xbf16, #tpu.memory_space<vmem>>, vector<32x196xbf16>
    %c0_1 = arith.constant 0 : index
    %c0_2 = arith.constant 0 : index
    %1 = vector.load %arg2[%c0_1, %c0_2] : memref<196x32xbf16, #tpu.memory_space<vmem>>, vector<196x32xbf16>
    %cst = arith.constant dense<0.000000e+00> : vector<32x32xf32>
    %2 = tpu.matmul %0, %1, %cst {dimension_numbers = #tpu.dot_dimension_numbers<[1], [0], [0], [1], [0, 0, 1, 1], [], []>} : vector<32x196xbf16>, vector<196x32xbf16>, vector<32x32xf32> -> vector<32x32xf32>
    %c0_3 = arith.constant 0 : index
    %c0_4 = arith.constant 0 : index
    %3 = vector.load %arg3[%c0_3, %c0_4] : memref<1x32xf32, #tpu.memory_space<vmem>>, vector<1x32xf32>
    %4 = vector.broadcast %3 : vector<1x32xf32> to vector<32x32xf32>
    %5 = arith.addf %2, %4 : vector<32x32xf32>
    %cst_5 = arith.constant dense<0.000000e+00> : vector<32xf32>
    %6 = vector.multi_reduction <add>, %5, %cst_5 [1] : vector<32x32xf32> to vector<32xf32>
    %7 = vector.shape_cast %6 : vector<32xf32> to vector<32x1xf32>
    %cst_6 = arith.constant 3.200000e+01 : f32
    %8 = vector.broadcast %cst_6 : f32 to vector<32x1xf32>
    %9 = arith.divf %7, %8 : vector<32x1xf32>
    %10 = vector.broadcast %9 : vector<32x1xf32> to vector<32x32xf32>
    %11 = arith.subf %5, %10 : vector<32x32xf32>
    %12 = arith.mulf %11, %11 : vector<32x32xf32>
    %cst_7 = arith.constant dense<0.000000e+00> : vector<32xf32>
    %13 = vector.multi_reduction <add>, %12, %cst_7 [1] : vector<32x32xf32> to vector<32xf32>
    %14 = vector.shape_cast %13 : vector<32xf32> to vector<32x1xf32>
    %cst_8 = arith.constant 3.200000e+01 : f32
    %15 = vector.broadcast %cst_8 : f32 to vector<32x1xf32>
    %16 = arith.divf %14, %15 : vector<32x1xf32>
    %cst_9 = arith.constant 9.99999974E-6 : f32
    %17 = vector.broadcast %cst_9 : f32 to vector<32x1xf32>
    %18 = arith.addf %16, %17 : vector<32x1xf32>
    %19 = math.rsqrt %18 : vector<32x1xf32>
    %20 = vector.broadcast %19 : vector<32x1xf32> to vector<32x32xf32>
    %21 = arith.mulf %11, %20 : vector<32x32xf32>
    %c0_10 = arith.constant 0 : index
    %c0_11 = arith.constant 0 : index
    %22 = vector.load %arg4[%c0_10, %c0_11] : memref<1x32xf32, #tpu.memory_space<vmem>>, vector<1x32xf32>
    %23 = vector.broadcast %22 : vector<1x32xf32> to vector<32x32xf32>
    %24 = arith.mulf %21, %23 : vector<32x32xf32>
    %c0_12 = arith.constant 0 : index
    %c0_13 = arith.constant 0 : index
    %25 = vector.load %arg5[%c0_12, %c0_13] : memref<1x32xf32, #tpu.memory_space<vmem>>, vector<1x32xf32>
    %26 = vector.broadcast %25 : vector<1x32xf32> to vector<32x32xf32>
    %27 = arith.addf %24, %26 : vector<32x32xf32>
    %c0_14 = arith.constant 0 : index
    %c0_15 = arith.constant 0 : index
    %28 = vector.load %arg6[%c0_14, %c0_15] : memref<32x32xf32, #tpu.memory_space<vmem>>, vector<32x32xf32>
    tpu.vector_store %arg6[%c0_14, %c0_15], %27 {strides = array<i32>} : memref<32x32xf32, #tpu.memory_space<vmem>>, vector<32x32xf32>,
    return
  }
  func.func @transform_0(%arg0: i32) -> (i32, i32) {
    %c0_i32 = arith.constant 0 : i32
    %c0_i32_0 = arith.constant 0 : i32
    return %arg0, %c0_i32 : i32, i32
  }
  func.func @transform_1(%arg0: i32) -> (i32, i32) {
    %c0_i32 = arith.constant 0 : i32
    %c0_i32_0 = arith.constant 0 : i32
    %c0_i32_1 = arith.constant 0 : i32
    return %c0_i32, %c0_i32_0 : i32, i32
  }
  func.func @transform_2(%arg0: i32) -> (i32, i32) {
    %c0_i32 = arith.constant 0 : i32
    %c0_i32_0 = arith.constant 0 : i32
    %c0_i32_1 = arith.constant 0 : i32
    return %c0_i32, %c0_i32_0 : i32, i32
  }
  func.func @transform_3(%arg0: i32) -> (i32, i32) {
    %c0_i32 = arith.constant 0 : i32
    %c0_i32_0 = arith.constant 0 : i32
    %c0_i32_1 = arith.constant 0 : i32
    return %c0_i32, %c0_i32_0 : i32, i32
  }
  func.func @transform_4(%arg0: i32) -> (i32, i32) {
    %c0_i32 = arith.constant 0 : i32
    %c0_i32_0 = arith.constant 0 : i32
    %c0_i32_1 = arith.constant 0 : i32
    return %c0_i32, %c0_i32_0 : i32, i32
  }
  func.func @transform_5(%arg0: i32) -> (i32, i32) {
    %c0_i32 = arith.constant 0 : i32
    %c0_i32_0 = arith.constant 0 : i32
    return %arg0, %c0_i32 : i32, i32
  }
}

</mosaic_0001>

<bundles_post_ra>
// kernel: tpu_custom_call.1
= control target key start
LH: loop header
LB: loop body
LE: loop exit
PB: predicated region body
PF: predicated region fallthrough
CT: control target
= control target key end

     0   :  { %vm155_vm0 = vcmask 1041408   ;;  %s605_s0 = inlined_call_operand.vmem [shape: bf16[32,196], index: 0, kind: input, shape index: {}]   ;;  %s606_s1 = inlined_call_operand.vmem [shape: bf16[196,32], index: 1, kind: input, shape index: {}]   ;;  %s607_s2 = inlined_call_operand.vmem [shape: f32[1,32], index: 2, kind: input, shape index: {}]   ;;  %s608_s3 = inlined_call_operand.vmem [shape: f32[1,32], index: 3, kind: input, shape index: {}]   ;;  %s609_s4 = inlined_call_operand.vmem [shape: f32[1,32], index: 4, kind: input, shape index: {}]   ;;  %s610_s5 = inlined_call_operand.hbm [shape: f32[32,32], index: 5, kind: output, shape index: {}]  }
   0x1   :  { %v408_v0 = vld [vmem:[%s606_s1 + $0x38] sm:$0xff]  ;;  %v50_v1 = vld [vmem:[%s606_s1 + $0x60] sm:$0x3]  ;;  %v407_v3 = vld [vmem:[%s606_s1 + $0x30] sm:$0xff] }
   0x2   :  { %v122_v2 = vunpack.c.l.b16 %v50_v1  ;;  %159 = vmatpush.bf16.msra.mxu0 %v408_v0  ;;  %413 = vmatpush.bf16.msra.mxu2 %v408_v0  ;;  %v406_v6 = vld [vmem:[%s606_s1 + $0x28] sm:$0xff]  ;;  %v412_v7 = vld [vmem:[%s606_s1 + $0x58] sm:$0xff] }
   0x4   :  { %v135_v4 = vpack.c.b16 %v122_v2, %v122_v2 }
   0x6   :  { %v157_v5 = vsel %vm155_vm0, %v135_v4, 0  ;;  %160 = vmatpush.bf16.msra.mxu0 %v407_v3  ;;  %414 = vmatpush.bf16.msra.mxu2 %v407_v3 }
   0x7   :  { %421 = vmatpush.bf16.msra.mxu3 %v157_v5  ;;  %181 = vmatpush.bf16.msra.mxu1 %v157_v5 }
   0x8   :  { %10 = vsyncpa [#allocation3], 0  ;;  %v405_v8 = vld [vmem:[%s606_s1 + $0x20] sm:$0xff]  ;;  %v411_v9 = vld [vmem:[%s606_s1 + $0x50] sm:$0xff]  ;;  %vm148_vm1 = vcmask 556032   ;;  %vm197_vm2 = vcmask 261120  }
   0x9   :  { %v404_v10 = vld [vmem:[%s606_s1 + $0x18] sm:$0xff]  ;;  %v410_v11 = vld [vmem:[%s606_s1 + $0x48] sm:$0xff]  ;;  %v403_v12 = vld [vmem:[%s606_s1 + $0x10] sm:$0xff]  ;;  %v469_v49 = vmov 32.0   ;;  %s319_s15 = sshll.u32 %s610_s5, 4  ;;  %s471_s16 = smov 128   ;;  %s320_s15 = int_to_ptr.hbm [resolvable:$true] %s319_s15 }
   0xa   :  { %161 = vmatpush.bf16.msra.mxu0 %v406_v6  ;;  %415 = vmatpush.bf16.msra.mxu2 %v406_v6  ;;  %v409_v13 = vld [vmem:[%s606_s1 + $0x40] sm:$0xff]  ;;  %v399_v14 = vld [vmem:[%s605_s0 + $0x14] sm:$0xf]  ;;  %v343_v15 = vld [vmem:[%s605_s0 + $0x18] sm:$0xf0]  ;;  %433 = vrcp.f32 %v469_v49  ;;  %s472_s17 = smov 8  }
   0xb   :  { %422 = vmatpush.bf16.msra.mxu3 %v412_v7  ;;  %182 = vmatpush.bf16.msra.mxu1 %v412_v7  ;;  %v397_v16 = vld [vmem:[%s605_s0 + $0x4] sm:$0xf]  ;;  %v335_v17 = vld [vmem:[%s605_s0 + $0x8] sm:$0xf0]  ;;  %v346_v19 = vor.u32 %v399_v14, %v343_v15  ;;  %v333_v22 = vld [vmem:[%s605_s0] sm:$0xf] }
   0xc   :  { %v402_v18 = vld [vmem:[%s606_s1 + $0x8] sm:$0xff]  ;;  %v338_v20 = vor.u32 %v397_v16, %v335_v17  ;;  %v401_v21 = vld [vmem:[%s606_s1] sm:$0xff]  ;;  %v341_v24 = vld [vmem:[%s605_s0 + $0x10] sm:$0xf] }
   0xd   :  { %v398_v23 = vld [vmem:[%s605_s0 + $0x4] sm:$0xf0]  ;;  %v400_v25 = vld [vmem:[%s605_s0 + $0x14] sm:$0xf0]  ;;  %v430_v28 = vld [vmem:[%s607_s2] ss:$0 sm:$0xff] }
   0xe   :  { %162 = vmatpush.bf16.msra.mxu0 %v405_v8  ;;  %416 = vmatpush.bf16.msra.mxu2 %v405_v8  ;;  %v334_v26 = vor.u32 %v398_v23, %v333_v22  ;;  %v342_v27 = vor.u32 %v400_v25, %v341_v24 }
   0xf   :  { %423 = vmatpush.bf16.msra.mxu3 %v411_v9  ;;  %183 = vmatpush.bf16.msra.mxu1 %v411_v9 }
  0x10   :  { %v434_v50 = vpop.eup %433 }
  0x11   :  { %v211_v51 = vmul.f32 32.0, %v434_v50  ;;  %vm215_vm3 = vweird.f32 %v434_v50 }
  0x12   :  { %163 = vmatpush.bf16.msra.mxu0 %v404_v10  ;;  %417 = vmatpush.bf16.msra.mxu2 %v404_v10 }
  0x13   :  { %424 = vmatpush.bf16.msra.mxu3 %v410_v11  ;;  %184 = vmatpush.bf16.msra.mxu1 %v410_v11  ;;  %v212_v52 = vsub.f32 1.0, %v211_v51 }
  0x15   :  { %v213_v53 = vmul.f32 %v434_v50, %v212_v52 }
  0x16   :  { %164 = vmatpush.bf16.msra.mxu0 %v403_v12  ;;  %418 = vmatpush.bf16.msra.mxu2 %v403_v12 }
  0x17   :  { %425 = vmatpush.bf16.msra.mxu3 %v409_v13  ;;  %185 = vmatpush.bf16.msra.mxu1 %v409_v13  ;;  %v214_v54 = vadd.f32 %v434_v50, %v213_v53 }
  0x19   :  { %v216_v55 = vsel %vm215_vm3, %v434_v50, %v214_v54 }
  0x1a   :  { %165 = vmatpush.bf16.msra.mxu0 %v402_v18  ;;  %419 = vmatpush.bf16.msra.mxu2 %v402_v18 }
  0x1b   :  { %396 = vmatmul.msk.bf16.vlgmr.msra.gmra.mxu3 %vm148_vm1, %v346_v19  ;;  %395 = vmatmul.msk.bf16.vlgmr.msra.gmra.mxu1 %vm148_vm1, %v338_v20 }
  0x1e   :  { %166 = vmatpush.bf16.msra.mxu0 %v401_v21  ;;  %420 = vmatpush.bf16.msra.mxu2 %v401_v21 }
  0x21   :  { %167 = vmatmul.bf16.vlgmr.msra.gmra.mxu0 %v334_v26  ;;  %172 = vmatmul.bf16.vlgmr.msra.gmra.mxu2 %v342_v27 }
  0x98   :  { %v187_v30 = vpop.f32.mrf.mxu1 }
  0x9e   :  { %v168_v29 = vpop.f32.mrf.mxu0  ;;  %v192_v34 = vpop.f32.mrf.mxu3 }
  0x9f   :  { %v169_v31 = vadd.f32 %v430_v28, %v168_v29 }
  0xa0   :  { %v189_v40 = vpop.f32.mrf.mxu1 }
  0xa1   :  { %v188_v32 = vadd.f32 %v187_v30, %v169_v31 }
  0xa3   :  { %v198_v33 = vsel %vm197_vm2, %v188_v32, 0.0 }
  0xa4   :  { %v173_v35 = vpop.f32.mrf.mxu2  ;;  %199 = vadd.xlane.f32.xlu0 %v198_v33 }
  0xa5   :  { %v174_v36 = vadd.f32 %v430_v28, %v173_v35  ;;  %v431_v35 = vld [vmem:[%s608_s3] ss:$0 sm:$0xff]  ;;  %s470_s3 = smov [#allocation2]  }
  0xa6   :  { %v170_v37 = vpop.f32.mrf.mxu0  ;;  %v194_v46 = vpop.f32.mrf.mxu3 }
  0xa7   :  { %v171_v38 = vadd.f32 %v430_v28, %v170_v37  ;;  %v193_v39 = vadd.f32 %v192_v34, %v174_v36 }
  0xa9   :  { %v190_v41 = vadd.f32 %v189_v40, %v171_v38  ;;  %v204_v42 = vsel %vm197_vm2, %v193_v39, 0.0 }
  0xaa   :  { %205 = vadd.xlane.f32.xlu1 %v204_v42 }
  0xab   :  { %v201_v43 = vsel %vm197_vm2, %v190_v41, 0.0 }
  0xac   :  { %v175_v44 = vpop.f32.mrf.mxu2  ;;  %202 = vadd.xlane.f32.xlu0 %v201_v43 }
  0xad   :  { %v176_v45 = vadd.f32 %v430_v28, %v175_v44 }
  0xaf   :  { %v195_v47 = vadd.f32 %v194_v46, %v176_v45 }
  0xb1   :  { %v207_v48 = vsel %vm197_vm2, %v195_v47, 0.0 }
  0xb2   :  { %208 = vadd.xlane.f32.xlu1 %v207_v48 }
 0x117   :  { %v200_v56 = vpop.xlane.xlu0 %199 }
 0x118   :  { %v217_v57 = vmul.f32 %v216_v55, %v200_v56 }
 0x11a   :  { %v221_v58 = vsub.f32 %v188_v32, %v217_v57 }
 0x11c   :  { %v225_v59 = vmul.f32 %v221_v58, %v221_v58 }
 0x11d   :  { %v206_v60 = vpop.xlane.xlu1 %205 }
 0x11e   :  { %v219_v61 = vmul.f32 %v216_v55, %v206_v60  ;;  %v229_v62 = vsel %vm197_vm2, %v225_v59, 0.0 }
 0x11f   :  { %230 = vadd.xlane.f32.xlu2 %v229_v62  ;;  %v203_v63 = vpop.xlane.xlu0 %202 }
 0x120   :  { %v574_v0 = vsub.f32 %v193_v39, %v219_v61  ;;  %v218_v1 = vmul.f32 %v216_v55, %v203_v63  ;;  %v432_v39 = vld [vmem:[%s609_s4] ss:$0 sm:$0xff]  ;;  %s317_s4 = sshll.u32 %s470_s3, 4  ;;  %s318_s4 = int_to_ptr.vmem [resolvable:$true] %s317_s4 }
 0x122   :  { %v576_v2 = vsub.f32 %v190_v41, %v218_v1  ;;  %v227_v3 = vmul.f32 %v574_v0, %v574_v0 }
 0x124   :  { %v235_v4 = vsel %vm197_vm2, %v227_v3, 0.0  ;;  %v226_v5 = vmul.f32 %v576_v2, %v576_v2 }
 0x125   :  { %v209_v6 = vpop.xlane.xlu1 %208  ;;  %236 = vadd.xlane.f32.xlu0 %v235_v4 }
 0x126   :  { %v220_v7 = vmul.f32 %v216_v55, %v209_v6  ;;  %v232_v8 = vsel %vm197_vm2, %v226_v5, 0.0 }
 0x127   :  { %233 = vadd.xlane.f32.xlu2 %v232_v8 }
 0x128   :  { %v584_v9 = vsub.f32 %v195_v47, %v220_v7 }
 0x12a   :  { %v228_v10 = vmul.f32 %v584_v9, %v584_v9 }
 0x12c   :  { %v238_v11 = vsel %vm197_vm2, %v228_v10, 0.0 }
 0x12d   :  { %239 = vadd.xlane.f32.xlu1 %v238_v11 }
 0x192   :  { %v231_v12 = vpop.xlane.xlu2 %230 }
 0x193   :  { %v241_v13 = vmul.f32 %v231_v12, %v216_v55 }
 0x195   :  { %v245_v14 = vadd.f32 1e-05, %v241_v13 }
 0x197   :  { %435 = vrsqrt.f32 %v245_v14  ;;  %vm255_vm5 = vweird.f32 %v245_v14 }
 0x198   :  { %v237_v15 = vpop.xlane.xlu0 %236 }
 0x199   :  { %v243_v16 = vmul.f32 %v237_v15, %v216_v55 }
 0x19a   :  { %v234_v17 = vpop.xlane.xlu2 %233 }
 0x19b   :  { %v247_v18 = vadd.f32 1e-05, %v243_v16  ;;  %v242_v19 = vmul.f32 %v234_v17, %v216_v55 }
 0x19d   :  { %v436_v20 = vpop.eup %435  ;;  %437 = vrsqrt.f32 %v247_v18  ;;  %v246_v21 = vadd.f32 1e-05, %v242_v19  ;;  %vm275_vm8 = vweird.f32 %v247_v18 }
 0x19e   :  { %v250_v22 = vmul.f32 %v436_v20, %v245_v14  ;;  %vm256_vm4 = vweird.f32 %v436_v20 }
 0x19f   :  { %439 = vrsqrt.f32 %v246_v21  ;;  %vm257_vm6 = vmor %vm255_vm5, %vm256_vm4  ;;  %vm265_vm11 = vweird.f32 %v246_v21 }
 0x1a0   :  { %v251_v23 = vmul.f32 %v436_v20, %v250_v22  ;;  %v240_v24 = vpop.xlane.xlu1 %239 }
 0x1a1   :  { %v244_v25 = vmul.f32 %v240_v24, %v216_v55 }
 0x1a2   :  { %v252_v26 = vmul.f32 0.5, %v251_v23 }
 0x1a3   :  { %v438_v27 = vpop.eup %437  ;;  %v248_v28 = vadd.f32 1e-05, %v244_v25 }
 0x1a4   :  { %v253_v29 = vsub.f32 1.5, %v252_v26  ;;  %v270_v30 = vmul.f32 %v438_v27, %v247_v18  ;;  %vm276_vm7 = vweird.f32 %v438_v27 }
 0x1a5   :  { %v440_v31 = vpop.eup %439  ;;  %441 = vrsqrt.f32 %v248_v28  ;;  %vm277_vm10 = vmor %vm275_vm8, %vm276_vm7  ;;  %vm285_vm14 = vweird.f32 %v248_v28 }
 0x1a6   :  { %v254_v32 = vmul.f32 %v436_v20, %v253_v29  ;;  %v271_v33 = vmul.f32 %v438_v27, %v270_v30  ;;  %v260_v34 = vmul.f32 %v440_v31, %v246_v21  ;;  %vm266_vm9 = vweird.f32 %v440_v31 }
 0x1a7   :  { %vm267_vm12 = vmor %vm265_vm11, %vm266_vm9 }
 0x1a8   :  { %v258_v36 = vsel %vm257_vm6, %v436_v20, %v254_v32  ;;  %v272_v37 = vmul.f32 0.5, %v271_v33  ;;  %v261_v38 = vmul.f32 %v440_v31, %v260_v34 }
 0x1a9   :  { %v289_v40 = vmul.f32 %v258_v36, %v221_v58 }
 0x1aa   :  { %v273_v41 = vsub.f32 1.5, %v272_v37  ;;  %v262_v42 = vmul.f32 0.5, %v261_v38 }
 0x1ab   :  { %v442_v43 = vpop.eup %441  ;;  %v297_v44 = vmul.f32 %v431_v35, %v289_v40 }
 0x1ac   :  { %v274_v45 = vmul.f32 %v438_v27, %v273_v41  ;;  %v263_v46 = vsub.f32 1.5, %v262_v42  ;;  %v280_v47 = vmul.f32 %v442_v43, %v248_v28  ;;  %vm286_vm13 = vweird.f32 %v442_v43 }
 0x1ad   :  { %v305_v48 = vadd.f32 %v432_v39, %v297_v44  ;;  %vm287_vm15 = vmor %vm285_vm14, %vm286_vm13 }
 0x1ae   :  { %v278_v49 = vsel %vm277_vm10, %v438_v27, %v274_v45  ;;  %v264_v50 = vmul.f32 %v440_v31, %v263_v46  ;;  %v281_v51 = vmul.f32 %v442_v43, %v280_v47 }
 0x1af   :  { %309 = vst.msk [vmem:[#allocation2] sm:$0xff] %vm197_vm2, %v305_v48  ;;  %v291_v52 = vmul.f32 %v278_v49, %v574_v0 }
 0x1b0   :  { %v268_v53 = vsel %vm267_vm12, %v440_v31, %v264_v50  ;;  %v282_v54 = vmul.f32 0.5, %v281_v51 }
 0x1b1   :  { %v299_v55 = vmul.f32 %v431_v35, %v291_v52  ;;  %v290_v56 = vmul.f32 %v268_v53, %v576_v2 }
 0x1b2   :  { %v283_v57 = vsub.f32 1.5, %v282_v54 }
 0x1b3   :  { %v307_v58 = vadd.f32 %v432_v39, %v299_v55  ;;  %v298_v59 = vmul.f32 %v431_v35, %v290_v56 }
 0x1b4   :  { %v284_v60 = vmul.f32 %v442_v43, %v283_v57 }
 0x1b5   :  { %311 = vst.msk [vmem:[#allocation2 + $0x10] sm:$0xff] %vm197_vm2, %v307_v58  ;;  %v306_v61 = vadd.f32 %v432_v39, %v298_v59 }
 0x1b6   :  { %v288_v62 = vsel %vm287_vm15, %v442_v43, %v284_v60 }
 0x1b7   :  { %310 = vst.msk [vmem:[#allocation2 + $0x8] sm:$0xff] %vm197_vm2, %v306_v61  ;;  %v292_v63 = vmul.f32 %v288_v62, %v584_v9 }
 0x1b9   :  { %v300_v0 = vmul.f32 %v431_v35, %v292_v63 }
 0x1bb   :  { %v308_v1 = vadd.f32 %v432_v39, %v300_v0 }
 0x1bd   :  { %312 = vst.msk [vmem:[#allocation2 + $0x18] sm:$0xff] %vm197_vm2, %v308_v1 }
 0x1be   :  { %325 = dma.vmem_to_hbm [thread:$0]  %s318_s4, 512, %s320_s15, [#allocation3], %s471_s16, %s471_s16, %s472_s17  }
 0x1bf   :  { %467 = dma.done.wait [#allocation3], 512  }
 0x1c0   :  { %468 = vsyncadd [#allocation3], 4294966784 }
 0x1c1   :  { %330 = vsyncpa [#allocation3], 1 }

</bundles_post_ra>
